<compile_context>
chip_gen: v7x
topology: tpu7x:2x2x1
jax: 0.10.0
libtpu: 0.0.40
codegen_flags: <defaults>
</compile_context>

<pallas_src>
import functools

import jax
import jax.numpy as jnp
from jax import lax
from jax.experimental import pallas as pl
from jax.experimental.pallas import tpu as pltpu


def _ce_onehot_kernel(logit_ref, onehot_ref, out_ref, *, valid_cols, tile_cols):
    """One (1, C, TL) tile: -log_softmax over channels (sublane axis), weighted
    by onehot, reduced to a per-tile partial sum written to a lane-dense block."""
    x = logit_ref[0].astype(jnp.float32)      # (C, TL)
    y = onehot_ref[0].astype(jnp.float32)     # (C, TL)

    # Numerically-stable log-sum-exp over the channel (sublane) axis.
    m = jnp.max(x, axis=0, keepdims=True)                              # (1, TL)
    lse = m + jnp.log(jnp.sum(jnp.exp(x - m), axis=0, keepdims=True))  # (1, TL)

    # Exact:  sum_c (lse - x) * y  ==  lse * sum_c(y) - sum_c(x * y)
    # (correct even for all-zero or unnormalized one-hot rows).
    sum_y = jnp.sum(y, axis=0, keepdims=True)                          # (1, TL)
    xy = jnp.sum(x * y, axis=0, keepdims=True)                         # (1, TL)
    col_loss = lse * sum_y - xy                                        # (1, TL)

    def write_partial(cl):
        out_ref[...] = jnp.full(out_ref.shape, jnp.sum(cl), dtype=out_ref.dtype)

    if valid_cols % tile_cols != 0:
        # Ragged last tile: mask padded spatial columns, but only on that tile.
        j = pl.program_id(1)
        last = pl.num_programs(1) - 1

        @pl.when(j == last)
        def _():
            col = j * tile_cols + lax.broadcasted_iota(
                jnp.int32, (1, tile_cols), 1)
            write_partial(jnp.where(col < valid_cols, col_loss, 0.0))

        @pl.when(j != last)
        def _():
            write_partial(col_loss)
    else:
        write_partial(col_loss)


def _vmem_budget_bytes():
    """Half of physical VMEM (headroom for compiler scratch); works on v5e/v6e/v7x."""
    try:
        physical = pltpu.get_tpu_info().vmem_capacity_bytes
    except Exception:
        physical = 64 << 20   # conservative fallback (v7x per-core VMEM)
    return physical // 2


def cross_entropy_onehot_loss(logit, onehot, reduction="mean",
                              target_block_bytes=8 * 1024 * 1024):
    """logit/onehot: NCHW arrays (same shape). Returns scalar loss (float32)."""
    N, C, H, W = logit.shape
    L = H * W
    # Free reshapes (contiguous NCHW): channels stay on the sublane axis,
    # spatial (H*W) becomes the 128-wide lane axis. No transpose pass.
    x = logit.reshape(N, C, L)
    y = onehot.reshape(N, C, L)

    # ---- Spatial tile sizing against an explicit VMEM budget ----------------
    # Per spatial column: 2 pipeline buffers for each of the two input streams
    # plus ~3 block-sized f32 compute temporaries (f32 cast, exp, x*y).
    in_itemsize = logit.dtype.itemsize + onehot.dtype.itemsize
    bytes_per_col = C * (2 * in_itemsize + 3 * 4)
    budget = _vmem_budget_bytes()

    max_tl_vmem = max(128, (budget // bytes_per_col) // 128 * 128)
    max_itemsize = max(logit.dtype.itemsize, onehot.dtype.itemsize)
    tl_target = max(128, (target_block_bytes // (C * max_itemsize)) // 128 * 128)
    padded_l = pl.cdiv(L, 128) * 128
    tl = int(min(tl_target, max_tl_vmem, padded_l))
    num_l = pl.cdiv(L, tl)
    # TODO(synk): for very large C where even tl=128 blows the VMEM budget, add
    # a channel-tiled grid axis with a two-pass / online LSE.

    needed = tl * bytes_per_col + (1 << 20)
    vmem_limit_bytes = int(min(max(needed, 8 << 20), 2 * budget))

    kernel = functools.partial(_ce_onehot_kernel, valid_cols=L, tile_cols=tl)

    partials = pl.pallas_call(
        kernel,
        out_shape=jax.ShapeDtypeStruct((N, num_l, 8, 128), jnp.float32),
        grid_spec=pltpu.PrefetchScalarGridSpec(
            num_scalar_prefetch=0,
            grid=(N, num_l),
            in_specs=[
                pl.BlockSpec((1, C, tl), lambda n, j: (n, 0, j)),
                pl.BlockSpec((1, C, tl), lambda n, j: (n, 0, j)),
            ],
            out_specs=pl.BlockSpec((1, 1, 8, 128), lambda n, j: (n, j, 0, 0)),
        ),
        compiler_params=pltpu.CompilerParams(
            # Each grid step writes a distinct output block -> both axes can be
            # sharded across TensorCores (v7x megacore).
            dimension_semantics=("parallel", "parallel"),
            vmem_limit_bytes=vmem_limit_bytes,
        ),
    )(x, y)

    total = jnp.sum(partials[:, :, 0, 0])   # tree-sum of per-tile partials
    if reduction == "mean":
        return total / jnp.float32(N * L)
    elif reduction == "sum":
        return total
    else:
        # TODO(synk): reduction='none' (per-pixel loss map output) not implemented.
        raise NotImplementedError(reduction)


if __name__ == "__main__":
    key = jax.random.PRNGKey(0)
    k_logit, k_label = jax.random.split(key)

    N, C, H, W = 2, 4, 16, 16
    logit = jax.random.normal(k_logit, (N, C, H, W), dtype=jnp.float32)
    labels = jax.random.randint(k_label, (N, H, W), 0, C)
    # one-hot over the channel dim -> NCHW
    onehot = jnp.transpose(
        jax.nn.one_hot(labels, C, dtype=jnp.float32), (0, 3, 1, 2)
    )

    loss = cross_entropy_onehot_loss(logit, onehot, reduction="mean")
    loss = jax.block_until_ready(loss)

    # Pure-JAX reference check.
    ref = jnp.mean(jnp.sum(-jax.nn.log_softmax(logit, axis=1) * onehot, axis=1))
    assert jnp.allclose(loss, ref, rtol=1e-5, atol=1e-5), (loss, ref)

    # Also check 'sum' reduction.
    loss_sum = jax.block_until_ready(
        cross_entropy_onehot_loss(logit, onehot, reduction="sum"))
    ref_sum = jnp.sum(jnp.sum(-jax.nn.log_softmax(logit, axis=1) * onehot, axis=1))
    assert jnp.allclose(loss_sum, ref_sum, rtol=1e-5, atol=1e-5), (loss_sum, ref_sum)

    print("KERNEL_OK")
</pallas_src>

<mosaic_0001>
module attributes {stable_mosaic.version = 11 : i64} {
  func.func @_ce_onehot_kernel(%arg0: i32, %arg1: i32, %arg2: memref<1x4x256xf32, #tpu.memory_space<vmem>>, %arg3: memref<1x4x256xf32, #tpu.memory_space<vmem>>, %arg4: memref<1x1x8x128xf32, #tpu.memory_space<vmem>>) attributes {dimension_semantics = [#tpu.dimension_semantics<parallel>, #tpu.dimension_semantics<parallel>], iteration_bounds = array<i64: 2, 1>, scalar_prefetch = 0 : i64, scratch_operands = 0 : i64, tpu.core_type = #tpu.core_type<tc>, window_params = [{transform_indices = @transform_0, window_bounds = array<i64: 1, 4, 256>}, {transform_indices = @transform_1, window_bounds = array<i64: 1, 4, 256>}, {transform_indices = @transform_2, window_bounds = array<i64: 1, 1, 8, 128>}]} {
    %c0 = arith.constant 0 : index
    %c0_0 = arith.constant 0 : index
    %c0_1 = arith.constant 0 : index
    %0 = vector.load %arg2[%c0, %c0_0, %c0_1] : memref<1x4x256xf32, #tpu.memory_space<vmem>>, vector<1x4x256xf32>
    %1 = vector.shape_cast %0 : vector<1x4x256xf32> to vector<4x256xf32>
    %c0_2 = arith.constant 0 : index
    %c0_3 = arith.constant 0 : index
    %c0_4 = arith.constant 0 : index
    %2 = vector.load %arg3[%c0_2, %c0_3, %c0_4] : memref<1x4x256xf32, #tpu.memory_space<vmem>>, vector<1x4x256xf32>
    %3 = vector.shape_cast %2 : vector<1x4x256xf32> to vector<4x256xf32>
    %cst = arith.constant dense<0xFF800000> : vector<256xf32>
    %4 = vector.multi_reduction <maximumf>, %1, %cst [0] : vector<4x256xf32> to vector<256xf32>
    %5 = vector.shape_cast %4 : vector<256xf32> to vector<1x256xf32>
    %6 = vector.broadcast %5 : vector<1x256xf32> to vector<4x256xf32>
    %7 = arith.subf %1, %6 : vector<4x256xf32>
    %8 = math.exp %7 : vector<4x256xf32>
    %cst_5 = arith.constant dense<0.000000e+00> : vector<256xf32>
    %9 = vector.multi_reduction <add>, %8, %cst_5 [0] : vector<4x256xf32> to vector<256xf32>
    %10 = vector.shape_cast %9 : vector<256xf32> to vector<1x256xf32>
    %11 = math.log %10 : vector<1x256xf32>
    %12 = arith.addf %5, %11 : vector<1x256xf32>
    %cst_6 = arith.constant dense<0.000000e+00> : vector<256xf32>
    %13 = vector.multi_reduction <add>, %3, %cst_6 [0] : vector<4x256xf32> to vector<256xf32>
    %14 = vector.shape_cast %13 : vector<256xf32> to vector<1x256xf32>
    %15 = arith.mulf %1, %3 : vector<4x256xf32>
    %cst_7 = arith.constant dense<0.000000e+00> : vector<256xf32>
    %16 = vector.multi_reduction <add>, %15, %cst_7 [0] : vector<4x256xf32> to vector<256xf32>
    %17 = vector.shape_cast %16 : vector<256xf32> to vector<1x256xf32>
    %18 = arith.mulf %12, %14 : vector<1x256xf32>
    %19 = arith.subf %18, %17 : vector<1x256xf32>
    %20 = vector.shape_cast %19 : vector<1x256xf32> to vector<1x1x256xf32>
    %cst_8 = arith.constant dense<0.000000e+00> : vector<1xf32>
    %21 = vector.multi_reduction <add>, %20, %cst_8 [1, 2] : vector<1x1x256xf32> to vector<1xf32>
    %22 = vector.shape_cast %21 : vector<1xf32> to vector<1x1x1xf32>
    %23 = vector.extract %22[0, 0, 0] : f32 from vector<1x1x1xf32>
    %24 = vector.broadcast %23 : f32 to vector<1x1x8x128xf32>
    %c0_9 = arith.constant 0 : index
    %c0_10 = arith.constant 0 : index
    %c0_11 = arith.constant 0 : index
    %c0_12 = arith.constant 0 : index
    %25 = vector.load %arg4[%c0_9, %c0_10, %c0_11, %c0_12] : memref<1x1x8x128xf32, #tpu.memory_space<vmem>>, vector<1x1x8x128xf32>
    tpu.vector_store %arg4[%c0_9, %c0_10, %c0_11, %c0_12], %24 {strides = array<i32>} : memref<1x1x8x128xf32, #tpu.memory_space<vmem>>, vector<1x1x8x128xf32>,
    return
  }
  func.func @transform_0(%arg0: i32, %arg1: i32) -> (i32, i32, i32) {
    %c0_i32 = arith.constant 0 : i32
    %c0_i32_0 = arith.constant 0 : i32
    return %arg0, %c0_i32, %arg1 : i32, i32, i32
  }
  func.func @transform_1(%arg0: i32, %arg1: i32) -> (i32, i32, i32) {
    %c0_i32 = arith.constant 0 : i32
    %c0_i32_0 = arith.constant 0 : i32
    return %arg0, %c0_i32, %arg1 : i32, i32, i32
  }
  func.func @transform_2(%arg0: i32, %arg1: i32) -> (i32, i32, i32, i32) {
    %c0_i32 = arith.constant 0 : i32
    %c0_i32_0 = arith.constant 0 : i32
    %c0_i32_1 = arith.constant 0 : i32
    return %arg0, %arg1, %c0_i32, %c0_i32_0 : i32, i32, i32, i32
  }
}

</mosaic_0001>

<bundles_post_ra>
// kernel: tpu_custom_call.1
= control target key start
LH: loop header
LB: loop body
LE: loop exit
PB: predicated region body
PF: predicated region fallthrough
CT: control target
= control target key end

     0   :  { %7 = vsyncpa [#allocation3], 0  ;;  %s945_s0 = inlined_call_operand.hbm [shape: f32[2,4,256], index: 0, kind: input, shape index: {}]   ;;  %s946_s1 = inlined_call_operand.hbm [shape: f32[2,4,256], index: 1, kind: input, shape index: {}]   ;;  %s947_s2 = inlined_call_operand.hbm [shape: f32[2,1,8,128], index: 2, kind: output, shape index: {}]  }
   0x1   :  { %9 = vsyncpa [#allocation3 + $0x1], 0 }
   0x2   :  { %10 = vsyncpa [#allocation6], 0 }
   0x3   :  { %12 = vsyncpa [#allocation6 + $0x1], 0 }
   0x4   :  { %13 = vsyncpa [#allocation4], 0 }
   0x5   :  { %15 = vsyncpa [#allocation4 + $0x1], 0  ;;  %s712_s9 = smov 0   ;;  %s714_s10 = smov 0  }
   0x6   :  { %s716_s11 = smov 0   ;;  %s718_s12 = smov 0  }
   0x7   :  { %s720_s13 = smov 0   ;;  %s722_s14 = smov 0  }
   0x8 LB: > { %s449_s15 = sadd.s32 4294967295, %s692_s14   ;;  %s450_s16 = sadd.s32 4294967294, %s692_s14   ;;  %s692_s14 = sphi %s722_s14, %s21_s14   ;;  %s688_s13 = sphi %s720_s13, %s967_s13   ;;  %s684_s12 = sphi %s718_s12, %s966_s12   ;;  %s680_s11 = sphi %s716_s11, %s965_s11   ;;  %s676_s10 = sphi %s714_s10, %s964_s10   ;;  %s672_s9 = sphi %s712_s9, %s963_s9  }
   0x9   : > { %s33_s17 = sadd.s32 1, %s688_s13  ;;  %s42_s18 = sadd.s32 1, %s680_s11 }
   0xa   : > { %p35_p0 = scmp.ge.s32.totalorder %s33_s17, 2  ;;  %p49_p1 = scmp.ne.s32.totalorder %s680_s11, %s676_s10 }
   0xb   : > { %p50_p2 = scmp.eq.s32.totalorder %s692_s14, 0  ;;  %p55_p3 = scmp.ne.s32.totalorder %s676_s10, %s672_s9 }
   0xc   : > { %s969_s17 = smov (%p35_p0, %s33_s17), 0  ;;  %p56_p5 = scmp.eq.s32.totalorder %s449_s15, 0 }
   0xd   : > { %p753_p4 = por %p50_p2, %p49_p1  ;;  %s37_s20 = ssub.s32 %s688_s13, %s969_s17 }
   0xe   : > { %p109_p6 = scmp.eq.s32.totalorder %s449_s15, 1  ;;  %p40_p7 = scmp.eq.s32.totalorder %s37_s20, 0 }
   0xf   : > { %p759_p8 = por %p56_p5, %p55_p3  ;;  %p115_p10 = scmp.eq.s32.totalorder %s450_s16, 1 }
  0x10   : > { %p763_p9 = por %p109_p6, %p49_p1  ;;  %p488_p13 = scmp.lt.s32.totalorder %s692_s14, 2 }
  0x11   : > { %s951_s21 = scalar_select %p759_p8, 1, 0 }
  0x12   : > { %s952_s22 = scalar_select %p763_p9, 1, 0 }
  0x13   : > { %s768_s23 = scalar_select %p40_p7, %s680_s11, %s42_s18  }
  0x14   : > { %p770_p11 = por %p115_p10, %p55_p3  ;;  %s777_s25 = sand.u32 1, %s680_s11  }
  0x15   : > { %s453_s26 = sshll.u32 %s777_s25, 3  ;;  %s467_s27 = sshll.u32 %s688_s13, 7 }
  0x16   : > { %s953_s24 = scalar_select %p770_p11, 1, 0 }
  0x17   : > { %s786_s30 = scalar_lea.hbm %s945_s0, %s467_s27  ;;  %s139_s3 = scalar_lea.vmem [#allocation2], %s453_s26 }
  0x18   : > { %s149_s4 = sshll.u32 %s139_s3, 4  ;;  %p794_p0 = pnand %p488_p13, %p753_p4  ;;  %s790_s4 = int_to_ptr.vmem [resolvable:$true] %s149_s4 }
  0x19   : > { %s136_s6 = scalar_lea.sflag [#allocation3], %s777_s25  ;;  %s546_s7 = scalar_lea.hbm %s786_s30, 128 }
  0x1a   : > { %p547_p3 = scmp.ne.s32.totalorder %s786_s30, %s546_s7  ;;  %p548_p5 = pneg %p794_p0 }
  0x1b   : > { %s551_s16 = scalar_lea.hbm %s945_s0, 256  ;;  %p552_p4 = scmp.lt.u32.totalorder %s786_s30, %s945_s0 }
  0x1c   : > { %p549_p6 = pnand %p548_p5, %p547_p3  ;;  %p553_p10 = scmp.lt.u32.totalorder %s551_s16, %s546_s7 }
  0x1d   : > { %p555_p12 = scmp.lt.u32.totalorder %s546_s7, %s786_s30 }
  0x1e   : > { %p550_p7 = pneg %p549_p6  ;;  %p554_p13 = por %p553_p10, %p552_p4 }
  0x20   : > { %p556_p1 = por %p555_p12, %p554_p13 }
  0x22   : > { %p557_p2 = pnand %p556_p1, %p550_p7 }
  0x24   : > { %560 = shalt.err (!%p557_p2)
}
  0x25   : > { %s561_s20 = scalar_lea.vmem %s790_s4, 128  ;;  %s694_s28 = smov [#allocation2]  }
  0x26   : > { %p562_p3 = scmp.ne.s32.totalorder %s790_s4, %s561_s20  ;;  %s566_s29 = sshll.u32 %s694_s28, 4  ;;  %s567_s29 = int_to_ptr.vmem [resolvable:$false] %s566_s29 }
  0x27   : > { %s568_s3 = scalar_lea.vmem %s567_s29, 256  ;;  %p569_p9 = scmp.lt.s32.totalorder %s790_s4, %s567_s29 }
  0x28   : > { %p564_p6 = pnand %p562_p3, %p548_p5  ;;  %p570_p4 = scmp.lt.s32.totalorder %s568_s3, %s561_s20 }
  0x2a   : > { %p565_p11 = pneg %p564_p6  ;;  %p571_p10 = por %p570_p4, %p569_p9 }
  0x2c   : > { %p572_p12 = pnand %p571_p10, %p565_p11 }
  0x2e   : > { %575 = shalt.err (!%p572_p12)
}
  0x2f   : > { %480 = dma.hbm_to_vmem [thread:$0]  (!%p794_p0), %s786_s30, 128, %s790_s4, %s136_s6  }
  0x30   : > { %p955_p1 = scmp.lt.s32.totalorder %s692_s14, 3  ;;  %p956_p2 = scmp.ge.s32.totalorder %s692_s14, 1 }
  0x31   : > { %s839_s16 = scalar_lea.hbm %s946_s1, %s467_s27  ;;  %s160_s18 = scalar_lea.vmem [#allocation5], %s453_s26 }
  0x32   : > { %p830_p7 = pnand %p956_p2, %p955_p1  ;;  %s170_s19 = sshll.u32 %s160_s18, 4  ;;  %s171_s19 = int_to_ptr.vmem [resolvable:$true] %s170_s19 }
  0x33   : > { %s157_s30 = scalar_lea.sflag [#allocation6], %s777_s25  ;;  %s576_s4 = scalar_lea.hbm %s839_s16, 128 }
  0x34   : > { %s957_s7 = scalar_select %p830_p7, 1, 0 }
  0x35   : > { %p577_p9 = scmp.ne.s32.totalorder %s839_s16, %s576_s4  ;;  %s581_s27 = scalar_lea.hbm %s946_s1, 256 }
  0x36   : > { %p582_p3 = scmp.lt.u32.totalorder %s839_s16, %s946_s1  ;;  %p583_p6 = scmp.lt.u32.totalorder %s581_s27, %s576_s4 }
  0x37   : > { %p579_p11 = pnand %p577_p9, %p548_p5  ;;  %p585_p10 = scmp.lt.u32.totalorder %s576_s4, %s839_s16 }
  0x38   : > { %p584_p4 = por %p583_p6, %p582_p3 }
  0x39   : > { %p580_p13 = pneg %p579_p11 }
  0x3a   : > { %p586_p12 = por %p585_p10, %p584_p4 }
  0x3c   : > { %p587_p1 = pnand %p586_p12, %p580_p13 }
  0x3e   : > { %590 = shalt.err (!%p587_p1)
}
  0x3f   : > { %s591_s25 = scalar_lea.vmem %s171_s19, 128  ;;  %s695_s26 = smov [#allocation5]  }
  0x40   : > { %p592_p2 = scmp.ne.s32.totalorder %s171_s19, %s591_s25  ;;  %s596_s3 = sshll.u32 %s695_s26, 4  ;;  %s597_s3 = int_to_ptr.vmem [resolvable:$false] %s596_s3 }
  0x41   : > { %s598_s8 = scalar_lea.vmem %s597_s3, 256  ;;  %p599_p8 = scmp.lt.s32.totalorder %s171_s19, %s597_s3 }
  0x42   : > { %p594_p9 = pnand %p592_p2, %p548_p5  ;;  %p600_p7 = scmp.lt.s32.totalorder %s598_s8, %s591_s25 }
  0x44   : > { %p595_p11 = pneg %p594_p9  ;;  %p601_p3 = por %p600_p7, %p599_p8 }
  0x46   : > { %p602_p6 = pnand %p601_p3, %p595_p11 }
  0x48   : > { %605 = shalt.err (!%p602_p6)
}
  0x49   : > { %483 = dma.hbm_to_vmem [thread:$0]  (!%p794_p0), %s839_s16, 128, %s171_s19, %s157_s30  }
  0x4a   : > { %p958_p13 = scmp.ne.s32.totalorder %s957_s7, 0 }
  0x4b   : > { %s866_s15 = sand.u32 (!%p958_p13), 1, %s676_s10   ;;  %p959_p8 = scmp.ne.s32.totalorder (!%p958_p13), %s951_s21, 0 }
  0x4c   : > { %179 = sbr.rel (%p958_p13) target bundleno = 375 (0x177), region = 28  ;;  %s869_s18 = sshll.u32 (!%p958_p13), %s866_s15, 3 }
  0x4d   : > { %s182_s4 = scalar_lea.sflag (!%p958_p13), [#allocation3], %s866_s15  ;;  %s185_s6 = scalar_lea.vmem (!%p958_p13), [#allocation2], %s869_s18 }
  0x53   : > { %659 = dma.done.wait (%p959_p8), %s182_s4, 128  }
  0x54   : > { %661 = vsyncadd (%p959_p8), %s182_s4, 4294967168  ;;  %s191_s5 = scalar_lea.sflag [#allocation6], %s866_s15  ;;  %s194_s7 = scalar_lea.vmem [#allocation5], %s869_s18 }
  0x55   : > { %663 = dma.done.wait (%p959_p8), %s191_s5, 128  }
  0x56   : > { %665 = vsyncadd (%p959_p8), %s191_s5, 4294967168  ;;  %vm227_vm0 = vcmask 1043456   ;;  %v222_v0 = vld [vmem:[%s185_s6] sm:$0xff]  ;;  %v223_v19 = vld [vmem:[%s194_s7] sm:$0xff]  ;;  %vm311_vm1 = vcmask 1040384   ;;  %s219_s21 = scalar_lea.vmem [#allocation7], %s869_s18 }
  0x57   : > { %v225_v1 = vcombine.high %v222_v0, %v222_v0  ;;  %v228_v2 = vsel %vm227_vm0, %v222_v0, -inf  ;;  %v289_v20 = vmul.f32 %v223_v19, %v222_v0  ;;  %v273_v22 = vcombine.high %v223_v19, %v223_v19  ;;  %s341_s16 = sshll.u32 %s219_s21, 4  ;;  %s464_s19 = sshll.u32 %s684_s12, 7  ;;  %s893_s16 = int_to_ptr.vmem [resolvable:$true] %s341_s16 }
  0x58   : > { %v229_v3 = vrot.slane %v228_v2, 4  ;;  %v275_v26 = vsel %vm227_vm0, %v223_v19, 0.0  ;;  %s898_s28 = scalar_lea.hbm %s947_s2, %s464_s19  ;;  %s327_s29 = scalar_lea.sflag [#allocation4], %s866_s15 }
  0x59   : > { %v235_v4 = vsel %vm227_vm0, %v225_v1, -inf  ;;  %v291_v27 = vcombine.high %v289_v20, %v289_v20  ;;  %v282_v31 = vsel %vm227_vm0, %v273_v22, 0.0  ;;  %v293_v32 = vsel %vm227_vm0, %v289_v20, 0.0  ;;  %s606_s25 = scalar_lea.vmem %s893_s16, 128  ;;  %p960_p5 = scmp.ne.s32.totalorder %s952_s22, 0 }
  0x5a   : > { %v230_v5 = vmax.f32 %v228_v2, %v229_v3  ;;  %v236_v6 = vrot.slane %v235_v4, 4  ;;  %v276_v33 = vrot.slane %v275_v26, 4  ;;  %v283_v37 = vrot.slane %v282_v31, 4  ;;  %p607_p0 = scmp.ne.s32.totalorder %s893_s16, %s606_s25  ;;  %s696_s12 = smov [#allocation7]  }
  0x5b   : > { %v300_v36 = vsel %vm227_vm0, %v291_v27, 0.0  ;;  %v294_v38 = vrot.slane %v293_v32, 4  ;;  %s610_s26 = sshll.u32 %s696_s12, 4  ;;  %s611_s26 = int_to_ptr.vmem [resolvable:$false] %s610_s26 }
  0x5c   : > { %v231_v7 = vrot.slane %v230_v5, 2  ;;  %v237_v8 = vmax.f32 %v235_v4, %v236_v6  ;;  %v277_v41 = vadd.f32 %v276_v33, %v275_v26  ;;  %v301_v42 = vrot.slane %v300_v36, 4  ;;  %p608_p7 = pnand %p607_p0, %p960_p5  ;;  %s612_s3 = scalar_lea.vmem %s611_s26, 256 }
  0x5d   : > { %v284_v45 = vadd.f32 %v283_v37, %v282_v31  ;;  %v295_v46 = vadd.f32 %v294_v38, %v293_v32  ;;  %p613_p10 = scmp.lt.s32.totalorder %s893_s16, %s611_s26  ;;  %p614_p12 = scmp.lt.s32.totalorder %s612_s3, %s606_s25 }
  0x5e   : > { %v232_v9 = vmax.f32 %v230_v5, %v231_v7  ;;  %v238_v10 = vrot.slane %v237_v8, 2  ;;  %v278_v49 = vrot.slane %v277_v41, 2  ;;  %v302_v50 = vadd.f32 %v301_v42, %v300_v36  ;;  %p609_p4 = pneg %p608_p7 }
  0x5f   : > { %v285_v52 = vrot.slane %v284_v45, 2  ;;  %v296_v53 = vrot.slane %v295_v46, 2  ;;  %p615_p1 = por %p614_p12, %p613_p10 }
  0x60   : > { %v233_v11 = vrot.slane %v232_v9, 1  ;;  %v239_v12 = vmax.f32 %v237_v8, %v238_v10  ;;  %v279_v54 = vadd.f32 %v278_v49, %v277_v41  ;;  %v303_v55 = vrot.slane %v302_v50, 2 }
  0x61   : > { %v286_v56 = vadd.f32 %v285_v52, %v284_v45  ;;  %v297_v57 = vadd.f32 %v296_v53, %v295_v46  ;;  %p616_p2 = pnand %p615_p1, %p609_p4 }
  0x62   : > { %v234_v13 = vmax.f32 %v232_v9, %v233_v11  ;;  %v240_v14 = vrot.slane %v239_v12, 1  ;;  %v280_v58 = vrot.slane %v279_v54, 1  ;;  %v304_v59 = vadd.f32 %v303_v55, %v302_v50 }
  0x63   : > { %v287_v60 = vrot.slane %v286_v56, 1  ;;  %v298_v61 = vrot.slane %v297_v57, 1 }
  0x64   : > { %v241_v15 = vmax.f32 %v239_v12, %v240_v14  ;;  %v305_v1 = vrot.slane %v304_v59, 1 }
  0x65   : > { %v288_v5 = vadd.f32 %v287_v60, %v286_v56  ;;  %v299_v6 = vadd.f32 %v298_v61, %v297_v57 }
  0x66   : > { %v244_v16 = vcombine.low %v234_v13, %v241_v15  ;;  %v306_v8 = vadd.f32 %v305_v1, %v304_v59 }
  0x68   : > { %v246_v17 = vsub.f32 %v222_v0, %v244_v16  ;;  %v281_v0 = vadd.f32 %v280_v58, %v279_v54 }
  0x6a   : > { %v247_v18 = vmul.f32 1.442695, %v246_v17 }
  0x6c   : > { %540 = vpow2.f32 %v247_v18 }
  0x76   : > { %v541_v21 = vpop.eup %540 }
  0x77   : > { %v250_v23 = vcombine.high %v541_v21, %v541_v21  ;;  %v252_v24 = vsel %vm227_vm0, %v541_v21, 0.0 }
  0x78   : > { %v253_v25 = vrot.slane %v252_v24, 4 }
  0x79   : > { %v259_v28 = vsel %vm227_vm0, %v250_v23, 0.0 }
  0x7a   : > { %v254_v29 = vadd.f32 %v253_v25, %v252_v24  ;;  %v260_v30 = vrot.slane %v259_v28, 4 }
  0x7c   : > { %v255_v34 = vrot.slane %v254_v29, 2  ;;  %v261_v35 = vadd.f32 %v260_v30, %v259_v28 }
  0x7e   : > { %v256_v39 = vadd.f32 %v255_v34, %v254_v29  ;;  %v262_v40 = vrot.slane %v261_v35, 2 }
  0x80   : > { %v257_v43 = vrot.slane %v256_v39, 1  ;;  %v263_v44 = vadd.f32 %v262_v40, %v261_v35 }
  0x82   : > { %v258_v47 = vadd.f32 %v257_v43, %v256_v39  ;;  %v264_v48 = vrot.slane %v263_v44, 1 }
  0x84   : > { %v265_v51 = vadd.f32 %v264_v48, %v263_v44  ;;  %542 = vlog2.f32 %v258_v47 }
  0x86   : > { %544 = vlog2.f32 %v265_v51 }
  0x8e   : > { %v543_v62 = vpop.eup %542 }
  0x8f   : > { %v267_v63 = vmul.f32 0.6931472, %v543_v62 }
  0x90   : > { %v545_v2 = vpop.eup %544 }
  0x91   : > { %v269_v3 = vmul.f32 0.6931472, %v545_v2  ;;  %v270_v4 = vadd.f32 %v267_v63, %v234_v13 }
  0x93   : > { %v271_v7 = vadd.f32 %v269_v3, %v241_v15  ;;  %v307_v9 = vmul.f32 %v281_v0, %v270_v4 }
  0x95   : > { %v308_v10 = vmul.f32 %v288_v5, %v271_v7  ;;  %v309_v11 = vsub.f32 %v307_v9, %v299_v6 }
  0x97   : > { %v310_v12 = vsub.f32 %v308_v10, %v306_v8  ;;  %v312_v14 = vsel %vm311_vm1, %v309_v11, 0.0 }
  0x99   : > { %v313_v16 = vsel %vm311_vm1, %v310_v12, 0.0 }
  0x9a   : > { %v314_v17 = vadd.f32 %v313_v16, %v312_v14 }
  0x9c   : > { %315 = vadd.xlane.f32.xlu0 %v314_v17 }
 0x129   : > { %v316_v18 = vpop.xlane.xlu0 %315 }
 0x12a   : > { %v317_v19 = vrot.slane %v316_v18, 4 }
 0x12c   : > { %v318_v20 = vadd.f32 %v317_v19, %v316_v18 }
 0x12e   : > { %v319_v13 = vrot.slane %v318_v20, 2 }
 0x130   : > { %v320_v21 = vadd.f32 %v319_v13, %v318_v20 }
 0x132   : > { %v321_v15 = vrot.slane %v320_v21, 1 }
 0x134   : > { %v322_v22 = vadd.f32 %v321_v15, %v320_v21 }
 0x136   : > { %469 = vpush %v322_v22 }
 0x167   : > { %s470_s30 = spop %469 }
 0x168   : > { %v324_v23 = vstv %s470_s30 }
 0x169   : > { %325 = vst [vmem:[%s219_s21] sm:$0xff] %v324_v23 }
 0x16a   : > { %619 = shalt.err (!%p616_p2)
}
 0x16b   : > { %s620_s8 = scalar_lea.hbm %s898_s28, 128  ;;  %s624_s4 = scalar_lea.hbm %s947_s2, 256 }
 0x16c   : > { %p621_p9 = scmp.ne.s32.totalorder %s898_s28, %s620_s8  ;;  %p625_p6 = scmp.lt.u32.totalorder %s898_s28, %s947_s2 }
 0x16d   : > { %p626_p13 = scmp.lt.u32.totalorder %s624_s4, %s620_s8  ;;  %p628_p0 = scmp.lt.u32.totalorder %s620_s8, %s898_s28 }
 0x16e   : > { %p622_p11 = pnand %p621_p9, %p960_p5 }
 0x16f   : > { %p627_p8 = por %p626_p13, %p625_p6 }
 0x170   : > { %p623_p3 = pneg %p622_p11 }
 0x171   : > { %p629_p7 = por %p628_p0, %p627_p8 }
 0x173   : > { %p630_p4 = pnand %p629_p7, %p623_p3 }
 0x175   : > { %633 = shalt.err (!%p630_p4)
}
 0x176   : > { %475 = dma.vmem_to_hbm [thread:$0]  (%p960_p5), %s893_s16, 128, %s898_s28, %s327_s29  }
 0x177 PF: > { %s353_s7 = sand.u32 1, %s672_s9   ;;  %p961_p10 = scmp.ne.s32.totalorder %s953_s24, 0 }
 0x178   : > { %p962_p12 = scmp.ge.s32.totalorder %s692_s14, 2  ;;  %s354_s21 = scalar_lea.sflag [#allocation4], %s353_s7 }
 0x17a   : > { %p485_p1 = pnand %p962_p12, %p961_p10 }
 0x17c   : > { %667 = dma.done.wait (!%p485_p1), %s354_s21, 128  }
 0x17d   : > { %669 = vsyncadd (!%p485_p1), %s354_s21, 4294967168  ;;  %s21_s14 = sadd.s32 1, %s692_s14   ;;  %s963_s9 = smov %s676_s10 }
 0x17e   : > { %p18_p2 = scmp.ge.s32.totalorder %s21_s14, 4   ;;  %s964_s10 = smov %s680_s11 }
 0x17f   : > { %s965_s11 = smov %s768_s23  ;;  %s966_s12 = smov %s688_s13 }
 0x180   : > { %s967_s13 = smov %s969_s17  ;;  %20 = sbr.rel (!%p18_p2) target bundleno = 8 (0x8), region = 86 }
 0x187   :  { %359 = vsyncpa [#allocation3], 1 }
 0x188   :  { %361 = vsyncpa [#allocation3 + $0x1], 1 }
 0x189   :  { %362 = vsyncpa [#allocation6], 1 }
 0x18a   :  { %364 = vsyncpa [#allocation6 + $0x1], 1 }
 0x18b   :  { %365 = vsyncpa [#allocation4], 1 }
 0x18c   :  { %367 = vsyncpa [#allocation4 + $0x1], 1 }

</bundles_post_ra>
